<compile_context>
chip_gen: v5e
topology: v5e:2x2
jax: 0.10.0
libtpu: 0.0.40
codegen_flags: <defaults>
</compile_context>

<pallas_src>
import functools
import math

import jax
import jax.numpy as jnp
from jax.experimental import pallas as pl
from jax.experimental.pallas import tpu as pltpu


def _denom_kernel(zrow_ref, zcolt_ref, logd_ref, acc_ref, *, correction):
    """Grid = (row_tiles, col_tiles) over the implicit [2B_pad, 2B_pad] Gram matrix.

    zrow_ref : [tm, D]   normalized rows of Z (padded with zero rows).
    zcolt_ref: [D, tn]   pre-transposed, pre-scaled columns (Zn / T)^T.
    acc_ref  : [tm, 128] lane-blocked running sums of exp(sim / T).
    logd_ref : [tm, 1]   per-row log(denominator), written on the last col tile.
    """
    j = pl.program_id(1)

    @pl.when(j == 0)
    def _init():
        acc_ref[...] = jnp.zeros_like(acc_ref)

    # [tm, D] @ [D, tn] -> [tm, tn].  Columns are already Zn^T / T, so `s` is
    # sim / temperature with no in-kernel transpose or scale.
    s = jnp.dot(zrow_ref[...], zcolt_ref[...], preferred_element_type=jnp.float32)
    e = jnp.exp(s)

    # Lane-blocked accumulation: per-step work is pure VALU adds over aligned
    # 128-lane groups; the lone cross-lane reduce is deferred to the epilogue.
    acc = acc_ref[...]
    tn = e.shape[1]
    for off in range(0, tn, 128):
        acc = acc + e[:, off:off + 128]
    acc_ref[...] = acc

    @pl.when(j == pl.num_programs(1) - 1)
    def _finalize():
        # correction = exp(1/T) (self-similarity of a unit-norm row) + number
        # of zero-padded columns (each contributes exp(0) = 1 to every row).
        denom = jnp.sum(acc_ref[...], axis=1, keepdims=True) - correction
        logd_ref[...] = jnp.log(denom)


def _pick_tiles(m_pad, d, budget_bytes):
    """Choose (tm, tn): multiples of 128 dividing m_pad, sized to the VMEM budget."""
    divs = [t for t in range(128, m_pad + 1, 128) if m_pad % t == 0]

    def footprint(tm, tn):
        # double-buffered f32 row/col tiles + (tm,128) scratch + score/exp temps
        return 4 * (2 * tm * d + 2 * d * tn + 128 * tm + 3 * tm * tn)

    # Column tile: >= 256 amortizes the ~0.35us/step overhead; larger tn only
    # spends VMEM that is better used on tm (HBM traffic scales with 1/tm).
    tn_pref = ([t for t in divs if 256 <= t <= 512]
               or [t for t in divs if t >= 256]
               or divs)
    tn = tn_pref[0]

    fitting = [t for t in divs if footprint(t, tn) <= budget_bytes]
    if not fitting:
        tn = divs[0]
        fitting = [t for t in divs if footprint(t, tn) <= budget_bytes] or [divs[0]]
    # Prefer >= 2 row tiles so the "parallel" axis can shard across 2 TCs (v7x).
    multi = [t for t in fitting if m_pad // t >= 2]
    tm = max(multi) if multi else max(fitting)
    return tm, tn


def contrastive_loss(proj_1, proj_2, temperature=0.5):
    """Pallas implementation of ContrastiveLoss.forward (returns the scalar loss)."""
    b, d = proj_1.shape
    m = 2 * b
    inv_t = 1.0 / float(temperature)

    # --- one-time O(B*D) preprocessing, hoisted out of the kernel grid ---
    # F.normalize(p=2, dim=1) with eps = 1e-12.
    def _norm(x):
        n = jnp.sqrt(jnp.sum(x * x, axis=1, keepdims=True))
        return x / jnp.maximum(n, 1e-12)

    z1n = _norm(proj_1.astype(jnp.float32))
    z2n = _norm(proj_2.astype(jnp.float32))
    zn = jnp.concatenate([z1n, z2n], axis=0)                  # [2B, D]

    # Pad rows to a multiple of 128 so all tiles stay MXU/lane aligned.
    m_pad = ((m + 127) // 128) * 128
    num_pad = m_pad - m
    zn_pad = jnp.pad(zn, ((0, num_pad), (0, 0))) if num_pad else zn
    # Pre-transposed, pre-scaled column operand: [D, 2B_pad].
    znt_scaled = jnp.transpose(zn_pad * jnp.float32(inv_t))

    tm, tn = _pick_tiles(m_pad, d, budget_bytes=40 << 20)
    grid = (m_pad // tm, m_pad // tn)

    # TODO(synk): an exactly-zero input row (norm clamped by eps) would need
    # exp(0) here instead of exp(1/T) to match the reference bit-for-bit.
    # TODO(synk): for extremely large D the D axis itself would need tiling.
    correction = math.exp(inv_t) + float(num_pad)
    kernel = functools.partial(_denom_kernel, correction=correction)

    log_denoms = pl.pallas_call(
        kernel,
        out_shape=jax.ShapeDtypeStruct((m_pad, 1), jnp.float32),
        grid_spec=pltpu.PrefetchScalarGridSpec(
            num_scalar_prefetch=0,
            grid=grid,
            in_specs=[
                pl.BlockSpec((tm, d), lambda i, j: (i, 0)),   # Zn row tile
                pl.BlockSpec((d, tn), lambda i, j: (0, j)),   # (Zn / T)^T col tile
            ],
            out_specs=pl.BlockSpec((tm, 1), lambda i, j: (i, 0)),
            scratch_shapes=[pltpu.VMEM((tm, 128), jnp.float32)],
        ),
        compiler_params=pltpu.CompilerParams(
            dimension_semantics=("parallel", "arbitrary"),
            vmem_limit_bytes=48 * 1024 * 1024),
    )(zn_pad, znt_scaled)

    # Tiny O(B) glue: positives (identical for both halves of Z) + final mean.
    # -log(exp(pos/T)/denom) == -(pos/T) + log(denom), summed over 2B rows.
    pos = jnp.sum(z1n * z2n, axis=1)                          # [B]
    loss = (jnp.sum(log_denoms[:m, 0]) - 2.0 * inv_t * jnp.sum(pos)) / float(m)
    return loss


def _reference_loss(proj_1, proj_2, temperature=0.5):
    """Pure-JAX reference mirroring the PyTorch module."""
    b = proj_1.shape[0]
    z = jnp.concatenate([proj_1, proj_2], axis=0).astype(jnp.float32)
    zn = z / jnp.maximum(jnp.sqrt(jnp.sum(z * z, axis=1, keepdims=True)), 1e-12)
    sim = zn @ zn.T
    pos = jnp.concatenate(
        [jnp.diagonal(sim, offset=b), jnp.diagonal(sim, offset=-b)], axis=0)
    mask = 1.0 - jnp.eye(2 * b, dtype=jnp.float32)
    denom = jnp.sum(mask * jnp.exp(sim / temperature), axis=1)
    losses = -jnp.log(jnp.exp(pos / temperature) / denom)
    return jnp.sum(losses) / (2 * b)


if __name__ == "__main__":
    batch = 8
    embedding_dim = 32
    temperature = 0.5

    key = jax.random.PRNGKey(0)
    k1, k2 = jax.random.split(key)
    proj_1 = jax.random.normal(k1, (batch, embedding_dim), dtype=jnp.float32)
    proj_2 = jax.random.normal(k2, (batch, embedding_dim), dtype=jnp.float32)

    loss = jax.block_until_ready(contrastive_loss(proj_1, proj_2, temperature))
    ref = jax.block_until_ready(_reference_loss(proj_1, proj_2, temperature))
    assert jnp.allclose(loss, ref, rtol=1e-4, atol=1e-4), (loss, ref)

    print("KERNEL_OK")
</pallas_src>

<mosaic_0001>
module attributes {stable_mosaic.version = 11 : i64} {
  func.func @_denom_kernel(%arg0: i32, %arg1: i32, %arg2: memref<128x32xf32, #tpu.memory_space<vmem>>, %arg3: memref<32x128xf32, #tpu.memory_space<vmem>>, %arg4: memref<128x1xf32, #tpu.memory_space<vmem>>, %arg5: memref<128x128xf32, #tpu.memory_space<vmem>>) attributes {dimension_semantics = [#tpu.dimension_semantics<parallel>, #tpu.dimension_semantics<arbitrary>], iteration_bounds = array<i64: 1, 1>, scalar_prefetch = 0 : i64, scratch_operands = 1 : i64, tpu.core_type = #tpu.core_type<tc>, window_params = [{transform_indices = @transform_0, window_bounds = array<i64: 128, 32>}, {transform_indices = @transform_1, window_bounds = array<i64: 32, 128>}, {transform_indices = @transform_2, window_bounds = array<i64: 128, 1>}]} {
    %c0_i32 = arith.constant 0 : i32
    %0 = arith.cmpi eq, %arg1, %c0_i32 : i32
    %1 = arith.extui %0 : i1 to i32
    %c0_i32_0 = arith.constant 0 : i32
    %2 = arith.cmpi ne, %1, %c0_i32_0 : i32
    scf.if %2 {
      %cst_10 = arith.constant 0.000000e+00 : f32
      %13 = vector.broadcast %cst_10 : f32 to vector<128x128xf32>
      %c0_11 = arith.constant 0 : index
      %c0_12 = arith.constant 0 : index
      %14 = vector.load %arg5[%c0_11, %c0_12] : memref<128x128xf32, #tpu.memory_space<vmem>>, vector<128x128xf32>
      tpu.vector_store %arg5[%c0_11, %c0_12], %13 {strides = array<i32>} : memref<128x128xf32, #tpu.memory_space<vmem>>, vector<128x128xf32>,
    } else {
    }
    %c0 = arith.constant 0 : index
    %c0_1 = arith.constant 0 : index
    %3 = vector.load %arg2[%c0, %c0_1] : memref<128x32xf32, #tpu.memory_space<vmem>>, vector<128x32xf32>
    %c0_2 = arith.constant 0 : index
    %c0_3 = arith.constant 0 : index
    %4 = vector.load %arg3[%c0_2, %c0_3] : memref<32x128xf32, #tpu.memory_space<vmem>>, vector<32x128xf32>
    %cst = arith.constant dense<0.000000e+00> : vector<128x128xf32>
    %5 = tpu.matmul %3, %4, %cst {dimension_numbers = #tpu.dot_dimension_numbers<[1], [0], [0], [1], [0, 0, 1, 1], [], []>} : vector<128x32xf32>, vector<32x128xf32>, vector<128x128xf32> -> vector<128x128xf32>
    %6 = math.exp %5 : vector<128x128xf32>
    %c0_4 = arith.constant 0 : index
    %c0_5 = arith.constant 0 : index
    %7 = vector.load %arg5[%c0_4, %c0_5] : memref<128x128xf32, #tpu.memory_space<vmem>>, vector<128x128xf32>
    %8 = arith.addf %7, %6 : vector<128x128xf32>
    %c0_6 = arith.constant 0 : index
    %c0_7 = arith.constant 0 : index
    %9 = vector.load %arg5[%c0_6, %c0_7] : memref<128x128xf32, #tpu.memory_space<vmem>>, vector<128x128xf32>
    tpu.vector_store %arg5[%c0_6, %c0_7], %8 {strides = array<i32>} : memref<128x128xf32, #tpu.memory_space<vmem>>, vector<128x128xf32>,
    %c0_i32_8 = arith.constant 0 : i32
    %10 = arith.cmpi eq, %arg1, %c0_i32_8 : i32
    %11 = arith.extui %10 : i1 to i32
    %c0_i32_9 = arith.constant 0 : i32
    %12 = arith.cmpi ne, %11, %c0_i32_9 : i32
    scf.if %12 {
      %c0_10 = arith.constant 0 : index
      %c0_11 = arith.constant 0 : index
      %13 = vector.load %arg5[%c0_10, %c0_11] : memref<128x128xf32, #tpu.memory_space<vmem>>, vector<128x128xf32>
      %cst_12 = arith.constant dense<0.000000e+00> : vector<128xf32>
      %14 = vector.multi_reduction <add>, %13, %cst_12 [1] : vector<128x128xf32> to vector<128xf32>
      %15 = vector.shape_cast %14 : vector<128xf32> to vector<128x1xf32>
      %cst_13 = arith.constant 119.389053 : f32
      %16 = vector.broadcast %cst_13 : f32 to vector<128x1xf32>
      %17 = arith.subf %15, %16 : vector<128x1xf32>
      %18 = math.log %17 : vector<128x1xf32>
      %c0_14 = arith.constant 0 : index
      %c0_15 = arith.constant 0 : index
      %19 = vector.load %arg4[%c0_14, %c0_15] : memref<128x1xf32, #tpu.memory_space<vmem>>, vector<128x1xf32>
      tpu.vector_store %arg4[%c0_14, %c0_15], %18 {strides = array<i32>} : memref<128x1xf32, #tpu.memory_space<vmem>>, vector<128x1xf32>,
    } else {
    }
    return
  }
  func.func @transform_0(%arg0: i32, %arg1: i32) -> (i32, i32) {
    %c0_i32 = arith.constant 0 : i32
    %c0_i32_0 = arith.constant 0 : i32
    return %arg0, %c0_i32 : i32, i32
  }
  func.func @transform_1(%arg0: i32, %arg1: i32) -> (i32, i32) {
    %c0_i32 = arith.constant 0 : i32
    %c0_i32_0 = arith.constant 0 : i32
    return %c0_i32, %arg1 : i32, i32
  }
  func.func @transform_2(%arg0: i32, %arg1: i32) -> (i32, i32) {
    %c0_i32 = arith.constant 0 : i32
    %c0_i32_0 = arith.constant 0 : i32
    return %arg0, %c0_i32 : i32, i32
  }
}

</mosaic_0001>

<bundles_post_ra>
// kernel: tpu_custom_call.1
= control target key start
LH: loop header
LB: loop body
LE: loop exit
PB: predicated region body
PF: predicated region fallthrough
CT: control target
= control target key end

     0   :  { %vm51_vm0 = vcmask 261120   ;;  %vm344_vm1 = vcmask 7168   ;;  %s628_s1 = inlined_call_operand.vmem [shape: f32[32,128], index: 1, kind: input, shape index: {}]   ;;  %s629_s0 = inlined_call_operand.vmem [shape: f32[128,32], index: 0, kind: input, shape index: {}]   ;;  %s630_s2 = inlined_call_operand.vmem [shape: f32[128,1], index: 2, kind: output, shape index: {}]  }
   0x1   :  { %v50_v0 = vld [vmem:[%s628_s1 + $0x18] sm:$0xff]  ;;  %v49_v1 = vld [vmem:[%s628_s1 + $0x10] sm:$0xff]  ;;  %v48_v2 = vld [vmem:[%s628_s1 + $0x8] sm:$0xff] }
   0x2   :  { %112 = vmatpush.msra.mxu0 %v50_v0  ;;  %397 = vmatpush.msra.mxu1 %v50_v0  ;;  %v47_v3 = vld [vmem:[%s628_s1] sm:$0xff]  ;;  %v32_v8 = vld [vmem:[%s629_s0 + $0x8] sm:$0xff]  ;;  %v33_v12 = vld [vmem:[%s629_s0 + $0x10] sm:$0xff] }
   0x3   :  { %398 = vmatpush.msra.mxu2 %v50_v0  ;;  %399 = vmatpush.msra.mxu3 %v50_v0  ;;  %v31_v4 = vld [vmem:[%s629_s0] sm:$0xff]  ;;  %v36_v9 = vld [vmem:[%s629_s0 + $0x28] sm:$0xff]  ;;  %v37_v13 = vld [vmem:[%s629_s0 + $0x30] sm:$0xff] }
   0x4   :  { %113 = vmatpush.msra.mxu0 %v49_v1  ;;  %400 = vmatpush.msra.mxu1 %v49_v1  ;;  %v35_v5 = vld [vmem:[%s629_s0 + $0x20] sm:$0xff]  ;;  %v40_v10 = vld [vmem:[%s629_s0 + $0x48] sm:$0xff]  ;;  %v41_v14 = vld [vmem:[%s629_s0 + $0x50] sm:$0xff] }
   0x5   :  { %401 = vmatpush.msra.mxu2 %v49_v1  ;;  %402 = vmatpush.msra.mxu3 %v49_v1  ;;  %v39_v6 = vld [vmem:[%s629_s0 + $0x40] sm:$0xff]  ;;  %v44_v11 = vld [vmem:[%s629_s0 + $0x68] sm:$0xff]  ;;  %v45_v15 = vld [vmem:[%s629_s0 + $0x70] sm:$0xff] }
   0x6   :  { %114 = vmatpush.msra.mxu0 %v48_v2  ;;  %403 = vmatpush.msra.mxu1 %v48_v2  ;;  %v43_v7 = vld [vmem:[%s629_s0 + $0x60] sm:$0xff]  ;;  %v34_v16 = vld [vmem:[%s629_s0 + $0x18] sm:$0xff] }
   0x7   :  { %404 = vmatpush.msra.mxu2 %v48_v2  ;;  %405 = vmatpush.msra.mxu3 %v48_v2  ;;  %v38_v17 = vld [vmem:[%s629_s0 + $0x38] sm:$0xff] }
   0x8   :  { %115 = vmatpush.msra.mxu0 %v47_v3  ;;  %406 = vmatpush.msra.mxu1 %v47_v3  ;;  %v42_v18 = vld [vmem:[%s629_s0 + $0x58] sm:$0xff] }
   0x9   :  { %365 = vmatmul.msk.f32.vlgmr.msra.gmra.mxu0 %vm51_vm0, %v31_v4  ;;  %369 = vmatmul.msk.f32.vlgmr.msra.gmra.mxu1 %vm51_vm0, %v35_v5  ;;  %v46_v19 = vld [vmem:[%s629_s0 + $0x78] sm:$0xff] }
   0xa   :  { %407 = vmatpush.msra.mxu2 %v47_v3  ;;  %408 = vmatpush.msra.mxu3 %v47_v3 }
   0xb   :  { %373 = vmatmul.msk.f32.vlgmr.msra.gmra.mxu2 %vm51_vm0, %v39_v6  ;;  %377 = vmatmul.msk.f32.vlgmr.msra.gmra.mxu3 %vm51_vm0, %v43_v7 }
  0x11   :  { %366 = vmatmul.msk.f32.gmra.mxu0 %vm51_vm0, %v32_v8  ;;  %370 = vmatmul.msk.f32.gmra.mxu1 %vm51_vm0, %v36_v9 }
  0x13   :  { %374 = vmatmul.msk.f32.gmra.mxu2 %vm51_vm0, %v40_v10  ;;  %378 = vmatmul.msk.f32.gmra.mxu3 %vm51_vm0, %v44_v11 }
  0x19   :  { %367 = vmatmul.msk.f32.gmra.mxu0 %vm51_vm0, %v33_v12  ;;  %371 = vmatmul.msk.f32.gmra.mxu1 %vm51_vm0, %v37_v13 }
  0x1b   :  { %375 = vmatmul.msk.f32.gmra.mxu2 %vm51_vm0, %v41_v14  ;;  %379 = vmatmul.msk.f32.gmra.mxu3 %vm51_vm0, %v45_v15 }
  0x21   :  { %368 = vmatmul.msk.f32.gmra.mxu0 %vm51_vm0, %v34_v16  ;;  %372 = vmatmul.msk.f32.gmra.mxu1 %vm51_vm0, %v38_v17 }
  0x23   :  { %376 = vmatmul.msk.f32.gmra.mxu2 %vm51_vm0, %v42_v18  ;;  %380 = vmatmul.msk.f32.gmra.mxu3 %vm51_vm0, %v46_v19 }
  0x86   :  { %v117_v20 = vpop.f32.mrf.mxu0  ;;  %v129_v21 = vpop.f32.mrf.mxu1 }
  0x87   :  { %v165_v22 = vmul.f32 1.442695, %v117_v20  ;;  %v173_v23 = vmul.f32 1.442695, %v129_v21 }
  0x89   :  { %409 = vpow2.f32 %v165_v22 }
  0x8a   :  { %411 = vpow2.f32 %v173_v23 }
  0x8e   :  { %v120_v24 = vpop.f32.mrf.mxu0  ;;  %v141_v25 = vpop.f32.mrf.mxu2 }
  0x8f   :  { %v410_v26 = vpop.eup %409  ;;  %v181_v27 = vmul.f32 1.442695, %v141_v25  ;;  %v153_v28 = vpop.f32.mrf.mxu3  ;;  %v167_v35 = vmul.f32 1.442695, %v120_v24 }
  0x90   :  { %v412_v29 = vpop.eup %411  ;;  %v189_v30 = vmul.f32 1.442695, %v153_v28  ;;  %264 = vadd.xlane.f32.xlu0 %v410_v26  ;;  %v132_v31 = vpop.f32.mrf.mxu1 }
  0x91   :  { %272 = vadd.xlane.f32.xlu2 %v412_v29  ;;  %413 = vpow2.f32 %v181_v27  ;;  %v175_v32 = vmul.f32 1.442695, %v132_v31 }
  0x92   :  { %415 = vpow2.f32 %v189_v30 }
  0x93   :  { %417 = vpow2.f32 %v175_v32 }
  0x96   :  { %v123_v33 = vpop.f32.mrf.mxu0  ;;  %v144_v34 = vpop.f32.mrf.mxu2 }
  0x97   :  { %v169_v36 = vmul.f32 1.442695, %v123_v33  ;;  %v156_v37 = vpop.f32.mrf.mxu3  ;;  %v414_v38 = vpop.eup %413  ;;  %v183_v44 = vmul.f32 1.442695, %v144_v34 }
  0x98   :  { %v416_v39 = vpop.eup %415  ;;  %v135_v40 = vpop.f32.mrf.mxu1  ;;  %v191_v1 = vmul.f32 1.442695, %v156_v37 }
  0x99   :  { %419 = vpow2.f32 %v169_v36  ;;  %280 = vadd.xlane.f32.xlu2 %v414_v38  ;;  %288 = vadd.xlane.f32.xlu0 %v416_v39  ;;  %v418_v41 = vpop.eup %417  ;;  %v177_v50 = vmul.f32 1.442695, %v135_v40 }
  0x9a   :  { %421 = vpow2.f32 %v167_v35 }
  0x9e   :  { %v147_v42 = vpop.f32.mrf.mxu2  ;;  %v126_v46 = vpop.f32.mrf.mxu0 }
  0x9f   :  { %v420_v43 = vpop.eup %419  ;;  %v185_v45 = vmul.f32 1.442695, %v147_v42  ;;  %v159_v47 = vpop.f32.mrf.mxu3  ;;  %v171_v49 = vmul.f32 1.442695, %v126_v46 }
  0xa0   :  { %268 = vadd.xlane.f32.xlu1 %v420_v43  ;;  %v422_v48 = vpop.eup %421  ;;  %v138_v54 = vpop.f32.mrf.mxu1  ;;  %v193_v58 = vmul.f32 1.442695, %v159_v47 }
  0xa1   :  { %423 = vpow2.f32 %v185_v45  ;;  %274 = vadd.xlane.f32.xlu2 %v418_v41  ;;  %266 = vadd.xlane.f32.xlu0 %v422_v48  ;;  %v179_v56 = vmul.f32 1.442695, %v138_v54 }
  0xa2   :  { %425 = vpow2.f32 %v183_v44 }
  0xa3   :  { %427 = vpow2.f32 %v171_v49 }
  0xa4   :  { %429 = vpow2.f32 %v177_v50 }
  0xa6   :  { %v150_v51 = vpop.f32.mrf.mxu2 }
  0xa7   :  { %v424_v52 = vpop.eup %423  ;;  %v187_v53 = vmul.f32 1.442695, %v150_v51  ;;  %v162_v57 = vpop.f32.mrf.mxu3 }
  0xa8   :  { %284 = vadd.xlane.f32.xlu1 %v424_v52  ;;  %v426_v55 = vpop.eup %425  ;;  %v195_v60 = vmul.f32 1.442695, %v162_v57 }
  0xa9   :  { %431 = vpow2.f32 %v187_v53  ;;  %282 = vadd.xlane.f32.xlu0 %v426_v55  ;;  %v428_v59 = vpop.eup %427 }
  0xaa   :  { %v430_v61 = vpop.eup %429  ;;  %433 = vpow2.f32 %v179_v56 }
  0xab   :  { %435 = vpow2.f32 %v193_v58 }
  0xac   :  { %437 = vpow2.f32 %v195_v60 }
  0xad   :  { %439 = vpow2.f32 %v191_v1 }
  0xaf   :  { %v432_v62 = vpop.eup %431 }
  0xb0   :  { %286 = vadd.xlane.f32.xlu2 %v432_v62  ;;  %270 = vadd.xlane.f32.xlu1 %v428_v59  ;;  %v434_v63 = vpop.eup %433 }
  0xb1   :  { %276 = vadd.xlane.f32.xlu0 %v430_v61  ;;  %v436_v0 = vpop.eup %435 }
  0xb2   :  { %v438_v2 = vpop.eup %437 }
  0xb3   :  { %v440_v3 = vpop.eup %439 }
  0xb8   :  { %292 = vadd.xlane.f32.xlu2 %v436_v0  ;;  %278 = vadd.xlane.f32.xlu1 %v434_v63 }
  0xb9   :  { %294 = vadd.xlane.f32.xlu0 %v438_v2 }
  0xc0   :  { %290 = vadd.xlane.f32.xlu1 %v440_v3 }
 0x103   :  { %v265_v4 = vpop.xlane.xlu0 %264 }
 0x104   :  { %v273_v5 = vpop.xlane.xlu2 %272  ;;  %v381_v6 = vadd.f32 -119.38905, %v265_v4 }
 0x105   :  { %v385_v7 = vadd.f32 -119.38905, %v273_v5 }
 0x106   :  { %441 = vlog2.f32 %v381_v6 }
 0x107   :  { %443 = vlog2.f32 %v385_v7 }
 0x10c   :  { %v442_v8 = vpop.eup %441  ;;  %v281_v9 = vpop.xlane.xlu2 %280 }
 0x10d   :  { %v444_v10 = vpop.eup %443  ;;  %v313_v11 = vmul.f32 0.6931472, %v442_v8  ;;  %v389_v12 = vadd.f32 -119.38905, %v281_v9  ;;  %v289_v13 = vpop.xlane.xlu0 %288 }
 0x10e   :  { %v321_v14 = vmul.f32 0.6931472, %v444_v10  ;;  %v393_v15 = vadd.f32 -119.38905, %v289_v13 }
 0x10f   :  { %345 = vst.msk [vmem:[%s630_s2] sm:$0xff] %vm344_vm1, %v313_v11  ;;  %445 = vlog2.f32 %v389_v12 }
 0x110   :  { %349 = vst.msk [vmem:[%s630_s2 + $0x20] sm:$0xff] %vm344_vm1, %v321_v14  ;;  %447 = vlog2.f32 %v393_v15 }
 0x113   :  { %v269_v16 = vpop.xlane.xlu1 %268 }
 0x114   :  { %v383_v17 = vadd.f32 -119.38905, %v269_v16  ;;  %v275_v18 = vpop.xlane.xlu2 %274 }
 0x115   :  { %v446_v19 = vpop.eup %445  ;;  %v267_v20 = vpop.xlane.xlu0 %266  ;;  %v386_v21 = vadd.f32 -119.38905, %v275_v18 }
 0x116   :  { %v448_v22 = vpop.eup %447  ;;  %v329_v23 = vmul.f32 0.6931472, %v446_v19  ;;  %v382_v24 = vadd.f32 -119.38905, %v267_v20  ;;  %449 = vlog2.f32 %v383_v17 }
 0x117   :  { %v337_v25 = vmul.f32 0.6931472, %v448_v22  ;;  %451 = vlog2.f32 %v386_v21 }
 0x118   :  { %353 = vst.msk [vmem:[%s630_s2 + $0x40] sm:$0xff] %vm344_vm1, %v329_v23  ;;  %453 = vlog2.f32 %v382_v24 }
 0x119   :  { %357 = vst.msk [vmem:[%s630_s2 + $0x60] sm:$0xff] %vm344_vm1, %v337_v25 }
 0x11b   :  { %v285_v26 = vpop.xlane.xlu1 %284 }
 0x11c   :  { %v450_v27 = vpop.eup %449  ;;  %v391_v28 = vadd.f32 -119.38905, %v285_v26 }
 0x11d   :  { %v452_v29 = vpop.eup %451  ;;  %v317_v30 = vmul.f32 0.6931472, %v450_v27  ;;  %v283_v31 = vpop.xlane.xlu0 %282 }
 0x11e   :  { %v454_v32 = vpop.eup %453  ;;  %v323_v33 = vmul.f32 0.6931472, %v452_v29  ;;  %v390_v34 = vadd.f32 -119.38905, %v283_v31  ;;  %455 = vlog2.f32 %v391_v28 }
 0x11f   :  { %v315_v35 = vmul.f32 0.6931472, %v454_v32  ;;  %347 = vst.msk [vmem:[%s630_s2 + $0x10] sm:$0xff] %vm344_vm1, %v317_v30 }
 0x120   :  { %350 = vst.msk [vmem:[%s630_s2 + $0x28] sm:$0xff] %vm344_vm1, %v323_v33  ;;  %457 = vlog2.f32 %v390_v34 }
 0x121   :  { %346 = vst.msk [vmem:[%s630_s2 + $0x8] sm:$0xff] %vm344_vm1, %v315_v35 }
 0x123   :  { %v287_v36 = vpop.xlane.xlu2 %286  ;;  %v271_v37 = vpop.xlane.xlu1 %270 }
 0x124   :  { %v456_v38 = vpop.eup %455  ;;  %v392_v39 = vadd.f32 -119.38905, %v287_v36  ;;  %v384_v40 = vadd.f32 -119.38905, %v271_v37 }
 0x125   :  { %v333_v41 = vmul.f32 0.6931472, %v456_v38  ;;  %v277_v42 = vpop.xlane.xlu0 %276 }
 0x126   :  { %v458_v43 = vpop.eup %457  ;;  %459 = vlog2.f32 %v392_v39  ;;  %v387_v44 = vadd.f32 -119.38905, %v277_v42 }
 0x127   :  { %v331_v45 = vmul.f32 0.6931472, %v458_v43  ;;  %355 = vst.msk [vmem:[%s630_s2 + $0x50] sm:$0xff] %vm344_vm1, %v333_v41  ;;  %461 = vlog2.f32 %v384_v40 }
 0x128   :  { %463 = vlog2.f32 %v387_v44 }
 0x129   :  { %354 = vst.msk [vmem:[%s630_s2 + $0x48] sm:$0xff] %vm344_vm1, %v331_v45 }
 0x12b   :  { %v293_v46 = vpop.xlane.xlu2 %292  ;;  %v279_v47 = vpop.xlane.xlu1 %278 }
 0x12c   :  { %v460_v48 = vpop.eup %459  ;;  %v395_v49 = vadd.f32 -119.38905, %v293_v46  ;;  %v388_v50 = vadd.f32 -119.38905, %v279_v47 }
 0x12d   :  { %v462_v51 = vpop.eup %461  ;;  %v335_v52 = vmul.f32 0.6931472, %v460_v48  ;;  %v295_v53 = vpop.xlane.xlu0 %294 }
 0x12e   :  { %v464_v54 = vpop.eup %463  ;;  %v319_v55 = vmul.f32 0.6931472, %v462_v51  ;;  %465 = vlog2.f32 %v395_v49  ;;  %v396_v56 = vadd.f32 -119.38905, %v295_v53 }
 0x12f   :  { %356 = vst.msk [vmem:[%s630_s2 + $0x58] sm:$0xff] %vm344_vm1, %v335_v52  ;;  %v325_v57 = vmul.f32 0.6931472, %v464_v54  ;;  %467 = vlog2.f32 %v388_v50 }
 0x130   :  { %348 = vst.msk [vmem:[%s630_s2 + $0x18] sm:$0xff] %vm344_vm1, %v319_v55  ;;  %469 = vlog2.f32 %v396_v56 }
 0x131   :  { %351 = vst.msk [vmem:[%s630_s2 + $0x30] sm:$0xff] %vm344_vm1, %v325_v57 }
 0x133   :  { %v291_v58 = vpop.xlane.xlu1 %290 }
 0x134   :  { %v466_v59 = vpop.eup %465  ;;  %v394_v60 = vadd.f32 -119.38905, %v291_v58 }
 0x135   :  { %v468_v61 = vpop.eup %467  ;;  %v341_v62 = vmul.f32 0.6931472, %v466_v59 }
 0x136   :  { %v470_v63 = vpop.eup %469  ;;  %v327_v0 = vmul.f32 0.6931472, %v468_v61  ;;  %471 = vlog2.f32 %v394_v60 }
 0x137   :  { %359 = vst.msk [vmem:[%s630_s2 + $0x70] sm:$0xff] %vm344_vm1, %v341_v62  ;;  %v343_v1 = vmul.f32 0.6931472, %v470_v63 }
 0x138   :  { %352 = vst.msk [vmem:[%s630_s2 + $0x38] sm:$0xff] %vm344_vm1, %v327_v0 }
 0x139   :  { %360 = vst.msk [vmem:[%s630_s2 + $0x78] sm:$0xff] %vm344_vm1, %v343_v1 }
 0x13c   :  { %v472_v2 = vpop.eup %471 }
 0x13d   :  { %v339_v3 = vmul.f32 0.6931472, %v472_v2 }
 0x13f   :  { %358 = vst.msk [vmem:[%s630_s2 + $0x68] sm:$0xff] %vm344_vm1, %v339_v3 }

</bundles_post_ra>
